<compile_context>
chip_gen: v5e
topology: v5e:2x2
jax: 0.10.0
libtpu: 0.0.40
codegen_flags: <defaults>
</compile_context>

<pallas_src>
import numpy as np
import jax
import jax.numpy as jnp
from jax.experimental import pallas as pl
from jax.experimental.pallas import tpu as pltpu


# ---------------------------------------------------------------------------
# Pallas kernel: fused tap-folded matmul(s) + scale/shift + activation epilogue
# ---------------------------------------------------------------------------
def _make_conv_kernel(n_in, act):
    def kernel(*refs):
        xs = refs[:n_in]
        ws = refs[n_in:2 * n_in]
        scale_ref, shift_ref, out_ref = refs[2 * n_in:]
        acc = jnp.dot(xs[0][...], ws[0][...], preferred_element_type=jnp.float32)
        for i in range(1, n_in):
            acc = acc + jnp.dot(xs[i][...], ws[i][...],
                                preferred_element_type=jnp.float32)
        y = acc * scale_ref[...] + shift_ref[...]
        if act == 'relu':
            y = jnp.maximum(y, 0.0)
        elif act == 'celu':
            alpha = 0.5
            y = jnp.maximum(y, 0.0) + alpha * (
                jnp.exp(jnp.minimum(y, 0.0) / alpha) - 1.0)
        out_ref[...] = y.astype(out_ref.dtype)

    return kernel


def conv_matmul_pallas(xcols, ws, scale, shift, act, tm=1024):
    """xcols[i]: (M, Ki) bf16, ws[i]: (Ki, Cout) bf16, scale/shift: (1, Cout) f32.

    Returns (M, Cout) f32.  Tiles M; weights + scale/shift stay VMEM-resident.
    """
    n_in = len(xcols)
    M = xcols[0].shape[0]
    Cout = ws[0].shape[-1]

    if M <= tm:
        TM, Mp = M, M                    # one block = full M (no constraint)
    else:
        TM = tm                          # multiple of 8/16 -> legal sublane tile
        Mp = ((M + TM - 1) // TM) * TM
        if Mp != M:
            xcols = [jnp.pad(x, ((0, Mp - M), (0, 0))) for x in xcols]
    grid = (Mp // TM,)

    in_specs = (
        [pl.BlockSpec((TM, x.shape[1]), lambda i: (i, 0)) for x in xcols]
        + [pl.BlockSpec((w.shape[0], Cout), lambda i: (0, 0)) for w in ws]
        + [pl.BlockSpec((1, Cout), lambda i: (0, 0)),
           pl.BlockSpec((1, Cout), lambda i: (0, 0))]
    )

    out = pl.pallas_call(
        _make_conv_kernel(n_in, act),
        out_shape=jax.ShapeDtypeStruct((Mp, Cout), jnp.float32),
        grid=grid,
        in_specs=in_specs,
        out_specs=pl.BlockSpec((TM, Cout), lambda i: (i, 0)),
        compiler_params=pltpu.CompilerParams(
            dimension_semantics=("parallel",),
            vmem_limit_bytes=48 * 1024 * 1024),
    )(*xcols, *ws, scale, shift)
    return out[:M] if Mp != M else out


# ---------------------------------------------------------------------------
# Glue: tap-folded im2col (bf16), BN folding, conv wrappers (all NHWC)
# ---------------------------------------------------------------------------
def _im2col_fused(xp_nhwc, K, Ho, Wo):
    """(N,Hp,Wp,C) padded -> (N*Ho*Wo, K*K*C) bf16, taps folded into channels."""
    xp = xp_nhwc.astype(jnp.bfloat16)
    N, Hp, Wp, C = xp.shape
    cols = [xp[:, ky:ky + Ho, kx:kx + Wo, :]
            for ky in range(K) for kx in range(K)]
    x = jnp.concatenate(cols, axis=-1)                 # (N, Ho, Wo, K*K*C)
    return x.reshape(N * Ho * Wo, K * K * C)


def _fold_scale_shift(cout, bias=None, bn=None):
    # BatchNorm evaluated in inference mode with fixed running statistics.
    if bn is None:
        scale = jnp.ones((cout,), jnp.float32)
        shift = jnp.zeros((cout,), jnp.float32) if bias is None else bias
    else:
        s = bn['gamma'] / jnp.sqrt(bn['var'] + bn['eps'])
        b0 = jnp.zeros((cout,), jnp.float32) if bias is None else bias
        scale = s
        shift = bn['beta'] + (b0 - bn['mean']) * s
    return (scale.reshape(1, cout).astype(jnp.float32),
            shift.reshape(1, cout).astype(jnp.float32))


def conv3x3(x_nhwc, w_oikk, bias=None, bn=None, act='none'):
    """Conv2d(k=3, stride=1, padding=1, padding_mode='reflect') [+BN][+act]."""
    N, H, W, Cin = x_nhwc.shape
    Cout = w_oikk.shape[0]
    xp = jnp.pad(x_nhwc, ((0, 0), (1, 1), (1, 1), (0, 0)), mode='reflect')
    xcol = _im2col_fused(xp, 3, H, W)
    wk = jnp.transpose(w_oikk, (2, 3, 1, 0)).reshape(9 * Cin, Cout)
    wk = wk.astype(jnp.bfloat16)
    scale, shift = _fold_scale_shift(Cout, bias, bn)
    out = conv_matmul_pallas([xcol], [wk], scale, shift, act)
    return out.reshape(N, H, W, Cout)


def node_conv(xa, xb, w_oikk, bn, act='relu'):
    """DeformConv applied to concat([xa, xb], channel) WITHOUT materializing
    the concatenated tensor: the weight is split along Cin and the two partial
    matmuls are summed inside one Pallas call."""
    N, H, W, Ca = xa.shape
    Cb = xb.shape[-1]
    Cout = w_oikk.shape[0]
    xpa = jnp.pad(xa, ((0, 0), (1, 1), (1, 1), (0, 0)), mode='reflect')
    xpb = jnp.pad(xb, ((0, 0), (1, 1), (1, 1), (0, 0)), mode='reflect')
    ca = _im2col_fused(xpa, 3, H, W)
    cb = _im2col_fused(xpb, 3, H, W)
    wa = jnp.transpose(w_oikk[:, :Ca], (2, 3, 1, 0)).reshape(9 * Ca, Cout)
    wb = jnp.transpose(w_oikk[:, Ca:], (2, 3, 1, 0)).reshape(9 * Cb, Cout)
    scale, shift = _fold_scale_shift(Cout, None, bn)
    out = conv_matmul_pallas([ca, cb], [wa.astype(jnp.bfloat16),
                                        wb.astype(jnp.bfloat16)],
                             scale, shift, act)
    return out.reshape(N, H, W, Cout)


def conv_transpose(x_nhwc, w_iokk, f):
    """ConvTranspose2d(Cin, Cout, 2f, stride=f, padding=f//2, bias=False),
    groups=1 (per the spec), via sub-pixel decomposition: a single matmul on
    the original HxW grid producing all f*f output phases, then pixel shuffle.
    For output oy = f*q + r:  out = sum_d X[q-d] * Wt[f*d + r + f//2],
    d in {0,1} if r < f//2 else {-1,0}  (and similarly for x)."""
    N, H, W, Cin = x_nhwc.shape
    Cout = w_iokk.shape[1]
    xp = jnp.pad(x_nhwc, ((0, 0), (1, 1), (1, 1), (0, 0)))     # zero padding
    xcol = _im2col_fused(xp, 3, H, W)                          # (M, 9*Cin)

    rows = []                                                  # over 3x3 taps
    for ty in range(3):                                        # tap ty -> d = 1 - ty
        for tx in range(3):
            cols = []                                          # over f*f phases
            for ry in range(f):
                for rx in range(f):
                    ok_y = (ty == 1) or (ty == 0 and ry < f // 2) \
                        or (ty == 2 and ry >= f // 2)
                    ok_x = (tx == 1) or (tx == 0 and rx < f // 2) \
                        or (tx == 2 and rx >= f // 2)
                    if ok_y and ok_x:
                        ky = f * (1 - ty) + ry + f // 2
                        kx = f * (1 - tx) + rx + f // 2
                        cols.append(w_iokk[:, :, ky, kx])      # (Cin, Cout)
                    else:
                        cols.append(jnp.zeros((Cin, Cout), w_iokk.dtype))
            rows.append(jnp.concatenate(cols, axis=1))         # (Cin, f*f*Cout)
    wk = jnp.concatenate(rows, axis=0).astype(jnp.bfloat16)    # (9*Cin, f*f*Cout)

    scale, shift = _fold_scale_shift(f * f * Cout)
    out = conv_matmul_pallas([xcol], [wk], scale, shift, 'none')   # (M, f*f*Cout)
    out = out.reshape(N, H, W, f, f, Cout)
    out = jnp.transpose(out, (0, 1, 3, 2, 4, 5)).reshape(N, H * f, W * f, Cout)
    return out


def maxpool2x2(x_nhwc):
    N, H, W, C = x_nhwc.shape
    return x_nhwc.reshape(N, H // 2, 2, W // 2, 2, C).max(axis=(2, 4))


# ---------------------------------------------------------------------------
# Deterministic parameter initialization (synthetic weights)
# ---------------------------------------------------------------------------
class KeyGen:
    def __init__(self, seed=0):
        self._key = jax.random.PRNGKey(seed)

    def __call__(self):
        self._key, k = jax.random.split(self._key)
        return k


def init_conv(kg, cin, cout, k, bias):
    w = jax.random.normal(kg(), (cout, cin, k, k), jnp.float32) / np.sqrt(cin * k * k)
    b = 0.05 * jax.random.normal(kg(), (cout,), jnp.float32) if bias else None
    return {'w': w, 'b': b}


def init_bn(kg, c):
    return {'gamma': 1.0 + 0.05 * jax.random.normal(kg(), (c,), jnp.float32),
            'beta': 0.05 * jax.random.normal(kg(), (c,), jnp.float32),
            'mean': 0.05 * jax.random.normal(kg(), (c,), jnp.float32),
            'var': 1.0 + 0.05 * jnp.abs(jax.random.normal(kg(), (c,), jnp.float32)),
            'eps': 1e-5}


# --- DeformConv: Conv3x3(reflect, no bias) -> BN -> ReLU ---------------------
def init_deform(kg, chi, cho):
    return {'conv': init_conv(kg, chi, cho, 3, False), 'bn': init_bn(kg, cho)}


def deform_fwd(p, x):
    return conv3x3(x, p['conv']['w'], None, p['bn'], 'relu')


# --- IDAUp -------------------------------------------------------------------
def init_idaup(kg, o, channels, up_f):
    p = {}
    for i in range(1, len(channels)):
        c, f = channels[i], int(up_f[i])
        p[f'proj_{i}'] = init_deform(kg, c, o)
        p[f'node_{i}'] = init_deform(kg, 2 * o, o)   # CONCAT_CHANNELS = True
        p[f'up_{i}'] = {
            'w': jax.random.normal(kg(), (o, o, 2 * f, 2 * f), jnp.float32)
                 / np.sqrt(o * (2 * f) ** 2),
            'f': f}
    return p


def idaup_fwd(p, layers, startp, endp):
    for i in range(startp + 1, endp):
        j = i - startp
        x = deform_fwd(p[f'proj_{j}'], layers[i])
        x = conv_transpose(x, p[f'up_{j}']['w'], p[f'up_{j}']['f'])
        # node(concat([upsampled, layers[i-1]])) with the concat folded into
        # the kernel call (two summed matmuls).
        layers[i] = node_conv(x, layers[i - 1], p[f'node_{j}']['conv']['w'],
                              p[f'node_{j}']['bn'], 'relu')


# --- DLAUp -------------------------------------------------------------------
def init_dlaup(kg, startp, channels, scales):
    p = {'startp': startp}
    channels = list(channels)
    in_channels = list(channels)
    scales = np.array(scales, dtype=int)
    for i in range(len(channels) - 1):
        j = -i - 2
        p[f'ida_{i}'] = init_idaup(kg, channels[j], in_channels[j:],
                                   scales[j:] // scales[j])
        scales[j + 1:] = scales[j]
        in_channels[j + 1:] = [channels[j] for _ in channels[j + 1:]]
    return p


def dlaup_fwd(p, layers):
    layers = list(layers)
    out = [layers[-1]]
    for i in range(len(layers) - p['startp'] - 1):
        idaup_fwd(p[f'ida_{i}'], layers, len(layers) - i - 2, len(layers))
        out.insert(0, layers[-1])
    return out


# --- Base backbone -----------------------------------------------------------
# TODO(synk): the original DLA backbone (`base_name`, e.g. dla34) is not part of
# the provided source; a minimal synthetic conv/BN/ReLU + MaxPool(2) pyramid
# exposing the same interface (features at stride 2**level, given channels)
# is used instead.
def init_base(kg, input_channels, channels):
    levels, cin = [], input_channels
    for c in channels:
        levels.append({'conv': init_conv(kg, cin, c, 3, False),
                       'bn': init_bn(kg, c)})
        cin = c
    return {'levels': levels, 'channels': list(channels)}


def base_fwd(p, x):
    feats, h = [], x
    for lvl, lp in enumerate(p['levels']):
        if lvl > 0:
            h = maxpool2x2(h)
        h = conv3x3(h, lp['conv']['w'], None, lp['bn'], 'relu')
        feats.append(h)
    return feats


# --- DLASeg ------------------------------------------------------------------
def init_dlaseg(kg, input_channels=3, channels=(8, 16, 32, 64),
                last_layer=2, head_convs=(16,), out_channel=2):
    channels = list(channels)
    p = {'first_level': 0, 'last_level': last_layer, 'channels': channels}
    p['base'] = init_base(kg, input_channels, channels)
    scales = [2 ** i for i in range(last_layer, len(channels))]
    p['dla_up'] = init_dlaup(kg, 0, channels[last_layer:], scales)
    p['ida_up'] = init_idaup(kg, channels[last_layer],
                             channels[0:last_layer + 1],
                             [2 ** i for i in range(last_layer + 1)])
    p['up'] = {'conv': init_conv(kg, channels[0], channels[last_layer], 3, False),
               'bn': init_bn(kg, channels[last_layer])}
    # head: Conv->(BN|Identity)->CELU(0.5) blocks, final Conv with bias.
    in_out = list(zip([channels[last_layer]] + list(head_convs),
                      list(head_convs) + [out_channel]))
    num_no_bn = 1
    head = []
    for i, (ci, co) in enumerate(in_out[:-1]):
        with_bn = i < len(in_out[:-1]) - num_no_bn
        head.append({'conv': init_conv(kg, ci, co, 3, not with_bn),
                     'bn': init_bn(kg, co) if with_bn else None,
                     'act': 'celu'})
    head.append({'conv': init_conv(kg, in_out[-1][0], in_out[-1][1], 3, True),
                 'bn': None, 'act': 'none'})
    p['head'] = head
    return p


def dlaseg_fwd(p, x_nchw):
    # NCHW only at the module boundary; channels-last everywhere inside.
    x = jnp.transpose(x_nchw, (0, 2, 3, 1))
    base_x = base_fwd(p['base'], x)
    ll, fl = p['last_level'], p['first_level']
    xs = dlaup_fwd(p['dla_up'], base_x[ll:])
    y = []
    for i in range(ll - fl + 1):
        if i == 0:
            base_x[0] = conv3x3(base_x[0], p['up']['conv']['w'], None,
                                p['up']['bn'], 'relu')
        if i < ll:
            y.append(base_x[i])
        else:
            y.append(xs[i - ll])
    idaup_fwd(p['ida_up'], y, 0, len(y))
    h = y[-1]
    for hp in p['head']:
        h = conv3x3(h, hp['conv']['w'], hp['conv']['b'], hp['bn'], hp['act'])
    return jnp.transpose(h, (0, 3, 1, 2))   # apply_tanh=False -> identity


if __name__ == "__main__":
    kg = KeyGen(0)
    params = init_dlaseg(kg, input_channels=3, channels=(8, 16, 32, 64),
                         last_layer=2, head_convs=(16,), out_channel=2)
    x = jax.random.normal(jax.random.PRNGKey(0), (2, 3, 16, 16), jnp.float32)
    out = dlaseg_fwd(params, x)
    out = jax.block_until_ready(out)
    assert out.shape == (2, 2, 16, 16), out.shape
    assert bool(jnp.all(jnp.isfinite(out)))
    print("KERNEL_OK")
</pallas_src>

<mosaic_0001>
module attributes {stable_mosaic.version = 11 : i64} {
  func.func @kernel(%arg0: i32, %arg1: memref<512x27xbf16, #tpu.memory_space<vmem>>, %arg2: memref<27x8xbf16, #tpu.memory_space<vmem>>, %arg3: memref<1x8xf32, #tpu.memory_space<vmem>>, %arg4: memref<1x8xf32, #tpu.memory_space<vmem>>, %arg5: memref<512x8xf32, #tpu.memory_space<vmem>>) attributes {dimension_semantics = [#tpu.dimension_semantics<parallel>], iteration_bounds = array<i64: 1>, scalar_prefetch = 0 : i64, scratch_operands = 0 : i64, tpu.core_type = #tpu.core_type<tc>, window_params = [{transform_indices = @transform_0, window_bounds = array<i64: 512, 27>}, {pipeline_mode = #tpu.pipeline_mode<synchronous>, transform_indices = @transform_1, window_bounds = array<i64: 27, 8>}, {pipeline_mode = #tpu.pipeline_mode<synchronous>, transform_indices = @transform_2, window_bounds = array<i64: 1, 8>}, {pipeline_mode = #tpu.pipeline_mode<synchronous>, transform_indices = @transform_3, window_bounds = array<i64: 1, 8>}, {transform_indices = @transform_4, window_bounds = array<i64: 512, 8>}]} {
    %c0 = arith.constant 0 : index
    %c0_0 = arith.constant 0 : index
    %0 = vector.load %arg1[%c0, %c0_0] : memref<512x27xbf16, #tpu.memory_space<vmem>>, vector<512x27xbf16>
    %c0_1 = arith.constant 0 : index
    %c0_2 = arith.constant 0 : index
    %1 = vector.load %arg2[%c0_1, %c0_2] : memref<27x8xbf16, #tpu.memory_space<vmem>>, vector<27x8xbf16>
    %cst = arith.constant dense<0.000000e+00> : vector<512x8xf32>
    %2 = tpu.matmul %0, %1, %cst {dimension_numbers = #tpu.dot_dimension_numbers<[1], [0], [0], [1], [0, 0, 1, 1], [], []>} : vector<512x27xbf16>, vector<27x8xbf16>, vector<512x8xf32> -> vector<512x8xf32>
    %c0_3 = arith.constant 0 : index
    %c0_4 = arith.constant 0 : index
    %3 = vector.load %arg3[%c0_3, %c0_4] : memref<1x8xf32, #tpu.memory_space<vmem>>, vector<1x8xf32>
    %4 = vector.broadcast %3 : vector<1x8xf32> to vector<512x8xf32>
    %5 = arith.mulf %2, %4 : vector<512x8xf32>
    %c0_5 = arith.constant 0 : index
    %c0_6 = arith.constant 0 : index
    %6 = vector.load %arg4[%c0_5, %c0_6] : memref<1x8xf32, #tpu.memory_space<vmem>>, vector<1x8xf32>
    %7 = vector.broadcast %6 : vector<1x8xf32> to vector<512x8xf32>
    %8 = arith.addf %5, %7 : vector<512x8xf32>
    %cst_7 = arith.constant 0.000000e+00 : f32
    %9 = vector.broadcast %cst_7 : f32 to vector<512x8xf32>
    %10 = arith.maximumf %8, %9 : vector<512x8xf32>
    %c0_8 = arith.constant 0 : index
    %c0_9 = arith.constant 0 : index
    %11 = vector.load %arg5[%c0_8, %c0_9] : memref<512x8xf32, #tpu.memory_space<vmem>>, vector<512x8xf32>
    tpu.vector_store %arg5[%c0_8, %c0_9], %10 {strides = array<i32>} : memref<512x8xf32, #tpu.memory_space<vmem>>, vector<512x8xf32>,
    return
  }
  func.func @transform_0(%arg0: i32) -> (i32, i32) {
    %c0_i32 = arith.constant 0 : i32
    %c0_i32_0 = arith.constant 0 : i32
    return %arg0, %c0_i32 : i32, i32
  }
  func.func @transform_1(%arg0: i32) -> (i32, i32) {
    %c0_i32 = arith.constant 0 : i32
    %c0_i32_0 = arith.constant 0 : i32
    %c0_i32_1 = arith.constant 0 : i32
    return %c0_i32, %c0_i32_0 : i32, i32
  }
  func.func @transform_2(%arg0: i32) -> (i32, i32) {
    %c0_i32 = arith.constant 0 : i32
    %c0_i32_0 = arith.constant 0 : i32
    %c0_i32_1 = arith.constant 0 : i32
    return %c0_i32, %c0_i32_0 : i32, i32
  }
  func.func @transform_3(%arg0: i32) -> (i32, i32) {
    %c0_i32 = arith.constant 0 : i32
    %c0_i32_0 = arith.constant 0 : i32
    %c0_i32_1 = arith.constant 0 : i32
    return %c0_i32, %c0_i32_0 : i32, i32
  }
  func.func @transform_4(%arg0: i32) -> (i32, i32) {
    %c0_i32 = arith.constant 0 : i32
    %c0_i32_0 = arith.constant 0 : i32
    return %arg0, %c0_i32 : i32, i32
  }
}

</mosaic_0001>

<bundles_post_ra>
// kernel: tpu_custom_call.1
= control target key start
LH: loop header
LB: loop body
LE: loop exit
PB: predicated region body
PF: predicated region fallthrough
CT: control target
= control target key end

     0   :  { %vm354_vm0 = vcmask 1044480   ;;  %vm355_vm1 = vcmask 1045504   ;;  %v1010_v2 = vmov 65535   ;;  %vm257_vm2 = vcmask 220160   ;;  %s1567_s1 = inlined_call_operand.vmem [shape: bf16[27,8], index: 1, kind: input, shape index: {}]   ;;  %s1568_s2 = inlined_call_operand.vmem [shape: f32[1,8], index: 2, kind: input, shape index: {}]   ;;  %s1569_s3 = inlined_call_operand.vmem [shape: f32[1,8], index: 3, kind: input, shape index: {}]   ;;  %s1570_s0 = inlined_call_operand.vmem [shape: bf16[512,27], index: 0, kind: input, shape index: {}]   ;;  %s1571_s4 = inlined_call_operand.vmem [shape: f32[512,8], index: 4, kind: output, shape index: {}]  }
   0x1   :  { %v933_v0 = vld [vmem:[%s1567_s1 + $0x8] sm:$0xf]  ;;  %v1000_v1 = vld [vmem:[%s1567_s1 + $0x8] sm:$0x30]  ;;  %v356_v3 = vsel %vm354_vm0, 4294967295, %v1010_v2  ;;  %v999_v7 = vld [vmem:[%s1567_s1] sm:$0xff] }
   0x2   :  { %v934_v4 = vor.u32 %v1000_v1, %v933_v0  ;;  %v357_v5 = vsel %vm355_vm1, %v356_v3, 0  ;;  %v967_v8 = vld [vmem:[%s1570_s0] sm:$0xff]  ;;  %v968_v12 = vld [vmem:[%s1570_s0 + $0x8] sm:$0xff]  ;;  %v969_v16 = vld [vmem:[%s1570_s0 + $0x10] sm:$0xff]  ;;  %vm730_vm3 = vcmask 64512  }
   0x3   :  { %v975_v9 = vld [vmem:[%s1570_s0 + $0x40] sm:$0xff]  ;;  %v976_v13 = vld [vmem:[%s1570_s0 + $0x48] sm:$0xff]  ;;  %v977_v17 = vld [vmem:[%s1570_s0 + $0x50] sm:$0xff] }
   0x4   :  { %v359_v6 = vand.u32 %v934_v4, %v357_v5  ;;  %v983_v10 = vld [vmem:[%s1570_s0 + $0x80] sm:$0xff]  ;;  %v984_v14 = vld [vmem:[%s1570_s0 + $0x88] sm:$0xff]  ;;  %v985_v18 = vld [vmem:[%s1570_s0 + $0x90] sm:$0xff] }
   0x5   :  { %v991_v11 = vld [vmem:[%s1570_s0 + $0xc0] sm:$0xff]  ;;  %v992_v15 = vld [vmem:[%s1570_s0 + $0xc8] sm:$0xff]  ;;  %v993_v19 = vld [vmem:[%s1570_s0 + $0xd0] sm:$0xff] }
   0x6   :  { %367 = vmatpush.bf16.msra.mxu0 %v359_v6  ;;  %1001 = vmatpush.bf16.msra.mxu1 %v359_v6  ;;  %v970_v20 = vld [vmem:[%s1570_s0 + $0x18] sm:$0xff]  ;;  %v971_v24 = vld [vmem:[%s1570_s0 + $0x20] sm:$0xff]  ;;  %v972_v28 = vld [vmem:[%s1570_s0 + $0x28] sm:$0xff] }
   0x7   :  { %1002 = vmatpush.bf16.msra.mxu2 %v359_v6  ;;  %1003 = vmatpush.bf16.msra.mxu3 %v359_v6  ;;  %v978_v21 = vld [vmem:[%s1570_s0 + $0x58] sm:$0xff]  ;;  %v979_v25 = vld [vmem:[%s1570_s0 + $0x60] sm:$0xff]  ;;  %v980_v29 = vld [vmem:[%s1570_s0 + $0x68] sm:$0xff] }
   0x8   :  { %v986_v22 = vld [vmem:[%s1570_s0 + $0x98] sm:$0xff]  ;;  %v987_v26 = vld [vmem:[%s1570_s0 + $0xa0] sm:$0xff]  ;;  %v988_v30 = vld [vmem:[%s1570_s0 + $0xa8] sm:$0xff] }
   0x9   :  { %v994_v23 = vld [vmem:[%s1570_s0 + $0xd8] sm:$0xff]  ;;  %v995_v27 = vld [vmem:[%s1570_s0 + $0xe0] sm:$0xff]  ;;  %v996_v31 = vld [vmem:[%s1570_s0 + $0xe8] sm:$0xff] }
   0xa   :  { %368 = vmatpush.bf16.msra.mxu0 %v999_v7  ;;  %1004 = vmatpush.bf16.msra.mxu1 %v999_v7  ;;  %v973_v32 = vld [vmem:[%s1570_s0 + $0x30] sm:$0xff]  ;;  %v974_v36 = vld [vmem:[%s1570_s0 + $0x38] sm:$0xff]  ;;  %v1176_v40 = vld [vmem:[%s1568_s2] ss:$0 sm:$0xff] }
   0xb   :  { %1005 = vmatpush.bf16.msra.mxu2 %v999_v7  ;;  %1006 = vmatpush.bf16.msra.mxu3 %v999_v7  ;;  %v981_v33 = vld [vmem:[%s1570_s0 + $0x70] sm:$0xff]  ;;  %v982_v37 = vld [vmem:[%s1570_s0 + $0x78] sm:$0xff]  ;;  %v1181_v41 = vld [vmem:[%s1569_s3] ss:$0 sm:$0xff] }
   0xc   :  { %v989_v34 = vld [vmem:[%s1570_s0 + $0xb0] sm:$0xff]  ;;  %v990_v38 = vld [vmem:[%s1570_s0 + $0xb8] sm:$0xff] }
   0xd   :  { %935 = vmatmul.msk.bf16.vlgmr.msra.gmra.mxu0 %vm257_vm2, %v967_v8  ;;  %943 = vmatmul.msk.bf16.vlgmr.msra.gmra.mxu1 %vm257_vm2, %v975_v9  ;;  %v997_v35 = vld [vmem:[%s1570_s0 + $0xf0] sm:$0xff]  ;;  %v998_v39 = vld [vmem:[%s1570_s0 + $0xf8] sm:$0xff] }
   0xe   :  { %951 = vmatmul.msk.bf16.vlgmr.msra.gmra.mxu2 %vm257_vm2, %v983_v10  ;;  %959 = vmatmul.msk.bf16.vlgmr.msra.gmra.mxu3 %vm257_vm2, %v991_v11 }
  0x1d   :  { %936 = vmatmul.msk.bf16.gmra.mxu0 %vm257_vm2, %v968_v12  ;;  %944 = vmatmul.msk.bf16.gmra.mxu1 %vm257_vm2, %v976_v13 }
  0x1e   :  { %952 = vmatmul.msk.bf16.gmra.mxu2 %vm257_vm2, %v984_v14  ;;  %960 = vmatmul.msk.bf16.gmra.mxu3 %vm257_vm2, %v992_v15 }
  0x2d   :  { %937 = vmatmul.msk.bf16.gmra.mxu0 %vm257_vm2, %v969_v16  ;;  %945 = vmatmul.msk.bf16.gmra.mxu1 %vm257_vm2, %v977_v17 }
  0x2e   :  { %953 = vmatmul.msk.bf16.gmra.mxu2 %vm257_vm2, %v985_v18  ;;  %961 = vmatmul.msk.bf16.gmra.mxu3 %vm257_vm2, %v993_v19 }
  0x3d   :  { %938 = vmatmul.msk.bf16.gmra.mxu0 %vm257_vm2, %v970_v20  ;;  %946 = vmatmul.msk.bf16.gmra.mxu1 %vm257_vm2, %v978_v21 }
  0x3e   :  { %954 = vmatmul.msk.bf16.gmra.mxu2 %vm257_vm2, %v986_v22  ;;  %962 = vmatmul.msk.bf16.gmra.mxu3 %vm257_vm2, %v994_v23 }
  0x4d   :  { %939 = vmatmul.msk.bf16.gmra.mxu0 %vm257_vm2, %v971_v24  ;;  %947 = vmatmul.msk.bf16.gmra.mxu1 %vm257_vm2, %v979_v25 }
  0x4e   :  { %955 = vmatmul.msk.bf16.gmra.mxu2 %vm257_vm2, %v987_v26  ;;  %963 = vmatmul.msk.bf16.gmra.mxu3 %vm257_vm2, %v995_v27 }
  0x5d   :  { %940 = vmatmul.msk.bf16.gmra.mxu0 %vm257_vm2, %v972_v28  ;;  %948 = vmatmul.msk.bf16.gmra.mxu1 %vm257_vm2, %v980_v29 }
  0x5e   :  { %956 = vmatmul.msk.bf16.gmra.mxu2 %vm257_vm2, %v988_v30  ;;  %964 = vmatmul.msk.bf16.gmra.mxu3 %vm257_vm2, %v996_v31 }
  0x6d   :  { %941 = vmatmul.msk.bf16.gmra.mxu0 %vm257_vm2, %v973_v32  ;;  %949 = vmatmul.msk.bf16.gmra.mxu1 %vm257_vm2, %v981_v33 }
  0x6e   :  { %957 = vmatmul.msk.bf16.gmra.mxu2 %vm257_vm2, %v989_v34  ;;  %965 = vmatmul.msk.bf16.gmra.mxu3 %vm257_vm2, %v997_v35 }
  0x7d   :  { %942 = vmatmul.msk.bf16.gmra.mxu0 %vm257_vm2, %v974_v36  ;;  %950 = vmatmul.msk.bf16.gmra.mxu1 %vm257_vm2, %v982_v37 }
  0x7e   :  { %958 = vmatmul.msk.bf16.gmra.mxu2 %vm257_vm2, %v990_v38  ;;  %966 = vmatmul.msk.bf16.gmra.mxu3 %vm257_vm2, %v998_v39 }
  0x8a   :  { %v370_v42 = vpop.f32.mrf.mxu0  ;;  %v410_v43 = vpop.f32.mrf.mxu1 }
  0x8b   :  { %v534_v44 = vmul.f32 %v1176_v40, %v370_v42  ;;  %v550_v45 = vmul.f32 %v1176_v40, %v410_v43 }
  0x8d   :  { %v602_v46 = vadd.f32 %v1181_v41, %v534_v44  ;;  %v618_v47 = vadd.f32 %v1181_v41, %v550_v45 }
  0x8f   :  { %v666_v48 = vmax.f32 %v602_v46, 0.0  ;;  %v682_v49 = vmax.f32 %v618_v47, 0.0 }
  0x91   :  { %731 = vst.msk [vmem:[%s1571_s4] sm:$0xff] %vm730_vm3, %v666_v48  ;;  %v450_v50 = vpop.f32.mrf.mxu2  ;;  %v490_v51 = vpop.f32.mrf.mxu3 }
  0x92   :  { %747 = vst.msk [vmem:[%s1571_s4 + $0x80] sm:$0xff] %vm730_vm3, %v682_v49  ;;  %v566_v52 = vmul.f32 %v1176_v40, %v450_v50  ;;  %v582_v53 = vmul.f32 %v1176_v40, %v490_v51  ;;  %v372_v54 = vpop.f32.mrf.mxu0  ;;  %v412_v55 = vpop.f32.mrf.mxu1 }
  0x93   :  { %v535_v56 = vmul.f32 %v1176_v40, %v372_v54  ;;  %v551_v57 = vmul.f32 %v1176_v40, %v412_v55 }
  0x94   :  { %v634_v58 = vadd.f32 %v1181_v41, %v566_v52  ;;  %v650_v59 = vadd.f32 %v1181_v41, %v582_v53 }
  0x95   :  { %v603_v60 = vadd.f32 %v1181_v41, %v535_v56  ;;  %v619_v61 = vadd.f32 %v1181_v41, %v551_v57 }
  0x96   :  { %v698_v62 = vmax.f32 %v634_v58, 0.0  ;;  %v714_v63 = vmax.f32 %v650_v59, 0.0 }
  0x97   :  { %v667_v0 = vmax.f32 %v603_v60, 0.0  ;;  %v683_v1 = vmax.f32 %v619_v61, 0.0 }
  0x98   :  { %763 = vst.msk [vmem:[%s1571_s4 + $0x100] sm:$0xff] %vm730_vm3, %v698_v62 }
  0x99   :  { %779 = vst.msk [vmem:[%s1571_s4 + $0x180] sm:$0xff] %vm730_vm3, %v714_v63  ;;  %v452_v2 = vpop.f32.mrf.mxu2  ;;  %v492_v3 = vpop.f32.mrf.mxu3 }
  0x9a   :  { %732 = vst.msk [vmem:[%s1571_s4 + $0x8] sm:$0xff] %vm730_vm3, %v667_v0  ;;  %v567_v4 = vmul.f32 %v1176_v40, %v452_v2  ;;  %v583_v5 = vmul.f32 %v1176_v40, %v492_v3  ;;  %v375_v6 = vpop.f32.mrf.mxu0  ;;  %v415_v7 = vpop.f32.mrf.mxu1 }
  0x9b   :  { %748 = vst.msk [vmem:[%s1571_s4 + $0x88] sm:$0xff] %vm730_vm3, %v683_v1  ;;  %v536_v8 = vmul.f32 %v1176_v40, %v375_v6  ;;  %v552_v9 = vmul.f32 %v1176_v40, %v415_v7 }
  0x9c   :  { %v635_v10 = vadd.f32 %v1181_v41, %v567_v4  ;;  %v651_v11 = vadd.f32 %v1181_v41, %v583_v5 }
  0x9d   :  { %v604_v12 = vadd.f32 %v1181_v41, %v536_v8  ;;  %v620_v13 = vadd.f32 %v1181_v41, %v552_v9 }
  0x9e   :  { %v699_v14 = vmax.f32 %v635_v10, 0.0  ;;  %v715_v15 = vmax.f32 %v651_v11, 0.0 }
  0x9f   :  { %v668_v16 = vmax.f32 %v604_v12, 0.0  ;;  %v684_v17 = vmax.f32 %v620_v13, 0.0 }
  0xa0   :  { %764 = vst.msk [vmem:[%s1571_s4 + $0x108] sm:$0xff] %vm730_vm3, %v699_v14 }
  0xa1   :  { %780 = vst.msk [vmem:[%s1571_s4 + $0x188] sm:$0xff] %vm730_vm3, %v715_v15  ;;  %v455_v18 = vpop.f32.mrf.mxu2  ;;  %v495_v19 = vpop.f32.mrf.mxu3 }
  0xa2   :  { %733 = vst.msk [vmem:[%s1571_s4 + $0x10] sm:$0xff] %vm730_vm3, %v668_v16  ;;  %v568_v20 = vmul.f32 %v1176_v40, %v455_v18  ;;  %v584_v21 = vmul.f32 %v1176_v40, %v495_v19  ;;  %v377_v22 = vpop.f32.mrf.mxu0  ;;  %v417_v23 = vpop.f32.mrf.mxu1 }
  0xa3   :  { %749 = vst.msk [vmem:[%s1571_s4 + $0x90] sm:$0xff] %vm730_vm3, %v684_v17  ;;  %v537_v24 = vmul.f32 %v1176_v40, %v377_v22  ;;  %v553_v25 = vmul.f32 %v1176_v40, %v417_v23 }
  0xa4   :  { %v636_v26 = vadd.f32 %v1181_v41, %v568_v20  ;;  %v652_v27 = vadd.f32 %v1181_v41, %v584_v21 }
  0xa5   :  { %v605_v28 = vadd.f32 %v1181_v41, %v537_v24  ;;  %v621_v29 = vadd.f32 %v1181_v41, %v553_v25 }
  0xa6   :  { %v700_v30 = vmax.f32 %v636_v26, 0.0  ;;  %v716_v31 = vmax.f32 %v652_v27, 0.0 }
  0xa7   :  { %v669_v32 = vmax.f32 %v605_v28, 0.0  ;;  %v685_v33 = vmax.f32 %v621_v29, 0.0 }
  0xa8   :  { %765 = vst.msk [vmem:[%s1571_s4 + $0x110] sm:$0xff] %vm730_vm3, %v700_v30 }
  0xa9   :  { %781 = vst.msk [vmem:[%s1571_s4 + $0x190] sm:$0xff] %vm730_vm3, %v716_v31  ;;  %v457_v34 = vpop.f32.mrf.mxu2  ;;  %v497_v35 = vpop.f32.mrf.mxu3 }
  0xaa   :  { %734 = vst.msk [vmem:[%s1571_s4 + $0x18] sm:$0xff] %vm730_vm3, %v669_v32  ;;  %v569_v36 = vmul.f32 %v1176_v40, %v457_v34  ;;  %v585_v37 = vmul.f32 %v1176_v40, %v497_v35  ;;  %v380_v38 = vpop.f32.mrf.mxu0  ;;  %v420_v39 = vpop.f32.mrf.mxu1 }
  0xab   :  { %750 = vst.msk [vmem:[%s1571_s4 + $0x98] sm:$0xff] %vm730_vm3, %v685_v33  ;;  %v538_v42 = vmul.f32 %v1176_v40, %v380_v38  ;;  %v554_v43 = vmul.f32 %v1176_v40, %v420_v39 }
  0xac   :  { %v637_v44 = vadd.f32 %v1181_v41, %v569_v36  ;;  %v653_v45 = vadd.f32 %v1181_v41, %v585_v37 }
  0xad   :  { %v606_v46 = vadd.f32 %v1181_v41, %v538_v42  ;;  %v622_v47 = vadd.f32 %v1181_v41, %v554_v43 }
  0xae   :  { %v701_v48 = vmax.f32 %v637_v44, 0.0  ;;  %v717_v49 = vmax.f32 %v653_v45, 0.0 }
  0xaf   :  { %v670_v50 = vmax.f32 %v606_v46, 0.0  ;;  %v686_v51 = vmax.f32 %v622_v47, 0.0 }
  0xb0   :  { %766 = vst.msk [vmem:[%s1571_s4 + $0x118] sm:$0xff] %vm730_vm3, %v701_v48 }
  0xb1   :  { %782 = vst.msk [vmem:[%s1571_s4 + $0x198] sm:$0xff] %vm730_vm3, %v717_v49  ;;  %v460_v52 = vpop.f32.mrf.mxu2  ;;  %v500_v53 = vpop.f32.mrf.mxu3 }
  0xb2   :  { %735 = vst.msk [vmem:[%s1571_s4 + $0x20] sm:$0xff] %vm730_vm3, %v670_v50  ;;  %v570_v54 = vmul.f32 %v1176_v40, %v460_v52  ;;  %v586_v55 = vmul.f32 %v1176_v40, %v500_v53  ;;  %v382_v56 = vpop.f32.mrf.mxu0  ;;  %v422_v57 = vpop.f32.mrf.mxu1 }
  0xb3   :  { %751 = vst.msk [vmem:[%s1571_s4 + $0xa0] sm:$0xff] %vm730_vm3, %v686_v51  ;;  %v539_v58 = vmul.f32 %v1176_v40, %v382_v56  ;;  %v555_v59 = vmul.f32 %v1176_v40, %v422_v57 }
  0xb4   :  { %v638_v60 = vadd.f32 %v1181_v41, %v570_v54  ;;  %v654_v61 = vadd.f32 %v1181_v41, %v586_v55 }
  0xb5   :  { %v607_v62 = vadd.f32 %v1181_v41, %v539_v58  ;;  %v623_v63 = vadd.f32 %v1181_v41, %v555_v59 }
  0xb6   :  { %v702_v0 = vmax.f32 %v638_v60, 0.0  ;;  %v718_v1 = vmax.f32 %v654_v61, 0.0 }
  0xb7   :  { %v671_v2 = vmax.f32 %v607_v62, 0.0  ;;  %v687_v3 = vmax.f32 %v623_v63, 0.0 }
  0xb8   :  { %767 = vst.msk [vmem:[%s1571_s4 + $0x120] sm:$0xff] %vm730_vm3, %v702_v0 }
  0xb9   :  { %783 = vst.msk [vmem:[%s1571_s4 + $0x1a0] sm:$0xff] %vm730_vm3, %v718_v1  ;;  %v462_v4 = vpop.f32.mrf.mxu2  ;;  %v502_v5 = vpop.f32.mrf.mxu3 }
  0xba   :  { %736 = vst.msk [vmem:[%s1571_s4 + $0x28] sm:$0xff] %vm730_vm3, %v671_v2  ;;  %v571_v6 = vmul.f32 %v1176_v40, %v462_v4  ;;  %v587_v7 = vmul.f32 %v1176_v40, %v502_v5  ;;  %v385_v8 = vpop.f32.mrf.mxu0  ;;  %v425_v9 = vpop.f32.mrf.mxu1 }
  0xbb   :  { %752 = vst.msk [vmem:[%s1571_s4 + $0xa8] sm:$0xff] %vm730_vm3, %v687_v3  ;;  %v540_v10 = vmul.f32 %v1176_v40, %v385_v8  ;;  %v556_v11 = vmul.f32 %v1176_v40, %v425_v9 }
  0xbc   :  { %v639_v12 = vadd.f32 %v1181_v41, %v571_v6  ;;  %v655_v13 = vadd.f32 %v1181_v41, %v587_v7 }
  0xbd   :  { %v608_v14 = vadd.f32 %v1181_v41, %v540_v10  ;;  %v624_v15 = vadd.f32 %v1181_v41, %v556_v11 }
  0xbe   :  { %v703_v16 = vmax.f32 %v639_v12, 0.0  ;;  %v719_v17 = vmax.f32 %v655_v13, 0.0 }
  0xbf   :  { %v672_v18 = vmax.f32 %v608_v14, 0.0  ;;  %v688_v19 = vmax.f32 %v624_v15, 0.0 }
  0xc0   :  { %768 = vst.msk [vmem:[%s1571_s4 + $0x128] sm:$0xff] %vm730_vm3, %v703_v16 }
  0xc1   :  { %784 = vst.msk [vmem:[%s1571_s4 + $0x1a8] sm:$0xff] %vm730_vm3, %v719_v17  ;;  %v465_v20 = vpop.f32.mrf.mxu2  ;;  %v505_v21 = vpop.f32.mrf.mxu3 }
  0xc2   :  { %737 = vst.msk [vmem:[%s1571_s4 + $0x30] sm:$0xff] %vm730_vm3, %v672_v18  ;;  %v572_v22 = vmul.f32 %v1176_v40, %v465_v20  ;;  %v588_v23 = vmul.f32 %v1176_v40, %v505_v21  ;;  %v387_v24 = vpop.f32.mrf.mxu0  ;;  %v427_v25 = vpop.f32.mrf.mxu1 }
  0xc3   :  { %753 = vst.msk [vmem:[%s1571_s4 + $0xb0] sm:$0xff] %vm730_vm3, %v688_v19  ;;  %v541_v26 = vmul.f32 %v1176_v40, %v387_v24  ;;  %v557_v27 = vmul.f32 %v1176_v40, %v427_v25 }
  0xc4   :  { %v640_v28 = vadd.f32 %v1181_v41, %v572_v22  ;;  %v656_v29 = vadd.f32 %v1181_v41, %v588_v23 }
  0xc5   :  { %v609_v30 = vadd.f32 %v1181_v41, %v541_v26  ;;  %v625_v31 = vadd.f32 %v1181_v41, %v557_v27 }
  0xc6   :  { %v704_v32 = vmax.f32 %v640_v28, 0.0  ;;  %v720_v33 = vmax.f32 %v656_v29, 0.0 }
  0xc7   :  { %v673_v34 = vmax.f32 %v609_v30, 0.0  ;;  %v689_v35 = vmax.f32 %v625_v31, 0.0 }
  0xc8   :  { %769 = vst.msk [vmem:[%s1571_s4 + $0x130] sm:$0xff] %vm730_vm3, %v704_v32 }
  0xc9   :  { %785 = vst.msk [vmem:[%s1571_s4 + $0x1b0] sm:$0xff] %vm730_vm3, %v720_v33  ;;  %v467_v36 = vpop.f32.mrf.mxu2  ;;  %v507_v37 = vpop.f32.mrf.mxu3 }
  0xca   :  { %738 = vst.msk [vmem:[%s1571_s4 + $0x38] sm:$0xff] %vm730_vm3, %v673_v34  ;;  %v573_v38 = vmul.f32 %v1176_v40, %v467_v36  ;;  %v589_v39 = vmul.f32 %v1176_v40, %v507_v37  ;;  %v390_v42 = vpop.f32.mrf.mxu0  ;;  %v430_v43 = vpop.f32.mrf.mxu1 }
  0xcb   :  { %754 = vst.msk [vmem:[%s1571_s4 + $0xb8] sm:$0xff] %vm730_vm3, %v689_v35  ;;  %v542_v44 = vmul.f32 %v1176_v40, %v390_v42  ;;  %v558_v45 = vmul.f32 %v1176_v40, %v430_v43 }
  0xcc   :  { %v641_v46 = vadd.f32 %v1181_v41, %v573_v38  ;;  %v657_v47 = vadd.f32 %v1181_v41, %v589_v39 }
  0xcd   :  { %v610_v48 = vadd.f32 %v1181_v41, %v542_v44  ;;  %v626_v49 = vadd.f32 %v1181_v41, %v558_v45 }
  0xce   :  { %v705_v50 = vmax.f32 %v641_v46, 0.0  ;;  %v721_v51 = vmax.f32 %v657_v47, 0.0 }
  0xcf   :  { %v674_v52 = vmax.f32 %v610_v48, 0.0  ;;  %v690_v53 = vmax.f32 %v626_v49, 0.0 }
  0xd0   :  { %770 = vst.msk [vmem:[%s1571_s4 + $0x138] sm:$0xff] %vm730_vm3, %v705_v50 }
  0xd1   :  { %786 = vst.msk [vmem:[%s1571_s4 + $0x1b8] sm:$0xff] %vm730_vm3, %v721_v51  ;;  %v470_v54 = vpop.f32.mrf.mxu2  ;;  %v510_v55 = vpop.f32.mrf.mxu3 }
  0xd2   :  { %739 = vst.msk [vmem:[%s1571_s4 + $0x40] sm:$0xff] %vm730_vm3, %v674_v52  ;;  %v574_v56 = vmul.f32 %v1176_v40, %v470_v54  ;;  %v590_v57 = vmul.f32 %v1176_v40, %v510_v55  ;;  %v392_v58 = vpop.f32.mrf.mxu0  ;;  %v432_v59 = vpop.f32.mrf.mxu1 }
  0xd3   :  { %755 = vst.msk [vmem:[%s1571_s4 + $0xc0] sm:$0xff] %vm730_vm3, %v690_v53  ;;  %v543_v60 = vmul.f32 %v1176_v40, %v392_v58  ;;  %v559_v61 = vmul.f32 %v1176_v40, %v432_v59 }
  0xd4   :  { %v642_v62 = vadd.f32 %v1181_v41, %v574_v56  ;;  %v658_v63 = vadd.f32 %v1181_v41, %v590_v57 }
  0xd5   :  { %v611_v0 = vadd.f32 %v1181_v41, %v543_v60  ;;  %v627_v1 = vadd.f32 %v1181_v41, %v559_v61 }
  0xd6   :  { %v706_v2 = vmax.f32 %v642_v62, 0.0  ;;  %v722_v3 = vmax.f32 %v658_v63, 0.0 }
  0xd7   :  { %v675_v4 = vmax.f32 %v611_v0, 0.0  ;;  %v691_v5 = vmax.f32 %v627_v1, 0.0 }
  0xd8   :  { %771 = vst.msk [vmem:[%s1571_s4 + $0x140] sm:$0xff] %vm730_vm3, %v706_v2 }
  0xd9   :  { %787 = vst.msk [vmem:[%s1571_s4 + $0x1c0] sm:$0xff] %vm730_vm3, %v722_v3  ;;  %v472_v6 = vpop.f32.mrf.mxu2  ;;  %v512_v7 = vpop.f32.mrf.mxu3 }
  0xda   :  { %740 = vst.msk [vmem:[%s1571_s4 + $0x48] sm:$0xff] %vm730_vm3, %v675_v4  ;;  %v575_v8 = vmul.f32 %v1176_v40, %v472_v6  ;;  %v591_v9 = vmul.f32 %v1176_v40, %v512_v7  ;;  %v395_v10 = vpop.f32.mrf.mxu0  ;;  %v435_v11 = vpop.f32.mrf.mxu1 }
  0xdb   :  { %756 = vst.msk [vmem:[%s1571_s4 + $0xc8] sm:$0xff] %vm730_vm3, %v691_v5  ;;  %v544_v12 = vmul.f32 %v1176_v40, %v395_v10  ;;  %v560_v13 = vmul.f32 %v1176_v40, %v435_v11 }
  0xdc   :  { %v643_v14 = vadd.f32 %v1181_v41, %v575_v8  ;;  %v659_v15 = vadd.f32 %v1181_v41, %v591_v9 }
  0xdd   :  { %v612_v16 = vadd.f32 %v1181_v41, %v544_v12  ;;  %v628_v17 = vadd.f32 %v1181_v41, %v560_v13 }
  0xde   :  { %v707_v18 = vmax.f32 %v643_v14, 0.0  ;;  %v723_v19 = vmax.f32 %v659_v15, 0.0 }
  0xdf   :  { %v676_v20 = vmax.f32 %v612_v16, 0.0  ;;  %v692_v21 = vmax.f32 %v628_v17, 0.0 }
  0xe0   :  { %772 = vst.msk [vmem:[%s1571_s4 + $0x148] sm:$0xff] %vm730_vm3, %v707_v18 }
  0xe1   :  { %788 = vst.msk [vmem:[%s1571_s4 + $0x1c8] sm:$0xff] %vm730_vm3, %v723_v19  ;;  %v475_v22 = vpop.f32.mrf.mxu2  ;;  %v515_v23 = vpop.f32.mrf.mxu3 }
  0xe2   :  { %741 = vst.msk [vmem:[%s1571_s4 + $0x50] sm:$0xff] %vm730_vm3, %v676_v20  ;;  %v576_v24 = vmul.f32 %v1176_v40, %v475_v22  ;;  %v592_v25 = vmul.f32 %v1176_v40, %v515_v23  ;;  %v397_v26 = vpop.f32.mrf.mxu0  ;;  %v437_v27 = vpop.f32.mrf.mxu1 }
  0xe3   :  { %757 = vst.msk [vmem:[%s1571_s4 + $0xd0] sm:$0xff] %vm730_vm3, %v692_v21  ;;  %v545_v28 = vmul.f32 %v1176_v40, %v397_v26  ;;  %v561_v29 = vmul.f32 %v1176_v40, %v437_v27 }
  0xe4   :  { %v644_v30 = vadd.f32 %v1181_v41, %v576_v24  ;;  %v660_v31 = vadd.f32 %v1181_v41, %v592_v25 }
  0xe5   :  { %v613_v32 = vadd.f32 %v1181_v41, %v545_v28  ;;  %v629_v33 = vadd.f32 %v1181_v41, %v561_v29 }
  0xe6   :  { %v708_v34 = vmax.f32 %v644_v30, 0.0  ;;  %v724_v35 = vmax.f32 %v660_v31, 0.0 }
  0xe7   :  { %v677_v36 = vmax.f32 %v613_v32, 0.0  ;;  %v693_v37 = vmax.f32 %v629_v33, 0.0 }
  0xe8   :  { %773 = vst.msk [vmem:[%s1571_s4 + $0x150] sm:$0xff] %vm730_vm3, %v708_v34 }
  0xe9   :  { %789 = vst.msk [vmem:[%s1571_s4 + $0x1d0] sm:$0xff] %vm730_vm3, %v724_v35  ;;  %v477_v38 = vpop.f32.mrf.mxu2  ;;  %v517_v39 = vpop.f32.mrf.mxu3 }
  0xea   :  { %742 = vst.msk [vmem:[%s1571_s4 + $0x58] sm:$0xff] %vm730_vm3, %v677_v36  ;;  %v577_v42 = vmul.f32 %v1176_v40, %v477_v38  ;;  %v593_v43 = vmul.f32 %v1176_v40, %v517_v39  ;;  %v400_v44 = vpop.f32.mrf.mxu0  ;;  %v440_v45 = vpop.f32.mrf.mxu1 }
  0xeb   :  { %758 = vst.msk [vmem:[%s1571_s4 + $0xd8] sm:$0xff] %vm730_vm3, %v693_v37  ;;  %v546_v46 = vmul.f32 %v1176_v40, %v400_v44  ;;  %v562_v47 = vmul.f32 %v1176_v40, %v440_v45 }
  0xec   :  { %v645_v48 = vadd.f32 %v1181_v41, %v577_v42  ;;  %v661_v49 = vadd.f32 %v1181_v41, %v593_v43 }
  0xed   :  { %v614_v50 = vadd.f32 %v1181_v41, %v546_v46  ;;  %v630_v51 = vadd.f32 %v1181_v41, %v562_v47 }
  0xee   :  { %v709_v52 = vmax.f32 %v645_v48, 0.0  ;;  %v725_v53 = vmax.f32 %v661_v49, 0.0 }
  0xef   :  { %v678_v54 = vmax.f32 %v614_v50, 0.0  ;;  %v694_v55 = vmax.f32 %v630_v51, 0.0 }
  0xf0   :  { %774 = vst.msk [vmem:[%s1571_s4 + $0x158] sm:$0xff] %vm730_vm3, %v709_v52 }
  0xf1   :  { %790 = vst.msk [vmem:[%s1571_s4 + $0x1d8] sm:$0xff] %vm730_vm3, %v725_v53  ;;  %v480_v56 = vpop.f32.mrf.mxu2  ;;  %v520_v57 = vpop.f32.mrf.mxu3 }
  0xf2   :  { %743 = vst.msk [vmem:[%s1571_s4 + $0x60] sm:$0xff] %vm730_vm3, %v678_v54  ;;  %v578_v58 = vmul.f32 %v1176_v40, %v480_v56  ;;  %v594_v59 = vmul.f32 %v1176_v40, %v520_v57  ;;  %v402_v60 = vpop.f32.mrf.mxu0  ;;  %v442_v61 = vpop.f32.mrf.mxu1 }
  0xf3   :  { %759 = vst.msk [vmem:[%s1571_s4 + $0xe0] sm:$0xff] %vm730_vm3, %v694_v55  ;;  %v547_v62 = vmul.f32 %v1176_v40, %v402_v60  ;;  %v563_v63 = vmul.f32 %v1176_v40, %v442_v61 }
  0xf4   :  { %v646_v0 = vadd.f32 %v1181_v41, %v578_v58  ;;  %v662_v1 = vadd.f32 %v1181_v41, %v594_v59 }
  0xf5   :  { %v615_v2 = vadd.f32 %v1181_v41, %v547_v62  ;;  %v631_v3 = vadd.f32 %v1181_v41, %v563_v63 }
  0xf6   :  { %v710_v4 = vmax.f32 %v646_v0, 0.0  ;;  %v726_v5 = vmax.f32 %v662_v1, 0.0 }
  0xf7   :  { %v679_v6 = vmax.f32 %v615_v2, 0.0  ;;  %v695_v7 = vmax.f32 %v631_v3, 0.0 }
  0xf8   :  { %775 = vst.msk [vmem:[%s1571_s4 + $0x160] sm:$0xff] %vm730_vm3, %v710_v4 }
  0xf9   :  { %791 = vst.msk [vmem:[%s1571_s4 + $0x1e0] sm:$0xff] %vm730_vm3, %v726_v5  ;;  %v482_v8 = vpop.f32.mrf.mxu2  ;;  %v522_v9 = vpop.f32.mrf.mxu3 }
  0xfa   :  { %744 = vst.msk [vmem:[%s1571_s4 + $0x68] sm:$0xff] %vm730_vm3, %v679_v6  ;;  %v579_v10 = vmul.f32 %v1176_v40, %v482_v8  ;;  %v595_v11 = vmul.f32 %v1176_v40, %v522_v9  ;;  %v405_v12 = vpop.f32.mrf.mxu0  ;;  %v445_v13 = vpop.f32.mrf.mxu1 }
  0xfb   :  { %760 = vst.msk [vmem:[%s1571_s4 + $0xe8] sm:$0xff] %vm730_vm3, %v695_v7  ;;  %v548_v14 = vmul.f32 %v1176_v40, %v405_v12  ;;  %v564_v15 = vmul.f32 %v1176_v40, %v445_v13 }
  0xfc   :  { %v647_v16 = vadd.f32 %v1181_v41, %v579_v10  ;;  %v663_v17 = vadd.f32 %v1181_v41, %v595_v11 }
  0xfd   :  { %v616_v18 = vadd.f32 %v1181_v41, %v548_v14  ;;  %v632_v19 = vadd.f32 %v1181_v41, %v564_v15 }
  0xfe   :  { %v711_v20 = vmax.f32 %v647_v16, 0.0  ;;  %v727_v21 = vmax.f32 %v663_v17, 0.0 }
  0xff   :  { %v680_v22 = vmax.f32 %v616_v18, 0.0  ;;  %v696_v23 = vmax.f32 %v632_v19, 0.0 }
 0x100   :  { %776 = vst.msk [vmem:[%s1571_s4 + $0x168] sm:$0xff] %vm730_vm3, %v711_v20 }
 0x101   :  { %792 = vst.msk [vmem:[%s1571_s4 + $0x1e8] sm:$0xff] %vm730_vm3, %v727_v21  ;;  %v485_v24 = vpop.f32.mrf.mxu2  ;;  %v525_v25 = vpop.f32.mrf.mxu3 }
 0x102   :  { %745 = vst.msk [vmem:[%s1571_s4 + $0x70] sm:$0xff] %vm730_vm3, %v680_v22  ;;  %v580_v26 = vmul.f32 %v1176_v40, %v485_v24  ;;  %v596_v27 = vmul.f32 %v1176_v40, %v525_v25  ;;  %v407_v28 = vpop.f32.mrf.mxu0  ;;  %v447_v29 = vpop.f32.mrf.mxu1 }
 0x103   :  { %761 = vst.msk [vmem:[%s1571_s4 + $0xf0] sm:$0xff] %vm730_vm3, %v696_v23  ;;  %v549_v30 = vmul.f32 %v1176_v40, %v407_v28  ;;  %v565_v31 = vmul.f32 %v1176_v40, %v447_v29 }
 0x104   :  { %v648_v32 = vadd.f32 %v1181_v41, %v580_v26  ;;  %v664_v33 = vadd.f32 %v1181_v41, %v596_v27 }
 0x105   :  { %v617_v34 = vadd.f32 %v1181_v41, %v549_v30  ;;  %v633_v35 = vadd.f32 %v1181_v41, %v565_v31 }
 0x106   :  { %v712_v36 = vmax.f32 %v648_v32, 0.0  ;;  %v728_v37 = vmax.f32 %v664_v33, 0.0 }
 0x107   :  { %v681_v38 = vmax.f32 %v617_v34, 0.0  ;;  %v697_v39 = vmax.f32 %v633_v35, 0.0 }
 0x108   :  { %777 = vst.msk [vmem:[%s1571_s4 + $0x170] sm:$0xff] %vm730_vm3, %v712_v36 }
 0x109   :  { %793 = vst.msk [vmem:[%s1571_s4 + $0x1f0] sm:$0xff] %vm730_vm3, %v728_v37  ;;  %v487_v42 = vpop.f32.mrf.mxu2  ;;  %v527_v43 = vpop.f32.mrf.mxu3 }
 0x10a   :  { %746 = vst.msk [vmem:[%s1571_s4 + $0x78] sm:$0xff] %vm730_vm3, %v681_v38  ;;  %v581_v44 = vmul.f32 %v1176_v40, %v487_v42  ;;  %v597_v45 = vmul.f32 %v1176_v40, %v527_v43 }
 0x10b   :  { %762 = vst.msk [vmem:[%s1571_s4 + $0xf8] sm:$0xff] %vm730_vm3, %v697_v39 }
 0x10c   :  { %v649_v46 = vadd.f32 %v1181_v41, %v581_v44  ;;  %v665_v47 = vadd.f32 %v1181_v41, %v597_v45 }
 0x10e   :  { %v713_v48 = vmax.f32 %v649_v46, 0.0  ;;  %v729_v49 = vmax.f32 %v665_v47, 0.0 }
 0x110   :  { %778 = vst.msk [vmem:[%s1571_s4 + $0x178] sm:$0xff] %vm730_vm3, %v713_v48 }
 0x111   :  { %794 = vst.msk [vmem:[%s1571_s4 + $0x1f8] sm:$0xff] %vm730_vm3, %v729_v49 }

</bundles_post_ra>
